<compile_context>
chip_gen: v7x
topology: tpu7x:2x2x1
jax: 0.10.0
libtpu: 0.0.40
codegen_flags: <defaults>
</compile_context>

<pallas_src>
import jax
import jax.numpy as jnp
from jax.experimental import pallas as pl
from jax.experimental.pallas import tpu as pltpu

NUM_HIDDEN = 32
LANE = 128            # vreg lane width: hidden dims are zero-padded to this
DEFAULT_TB = 1024     # max batch tile (per-step overhead amortization)
MIN_SPLIT = 128       # don't split the grid unless each step gets >= this many rows


# ----------------------------- kernels ------------------------------------- #

def _mlp(x_bf16, w1, b1, w2, b2, w3, b3):
    """Shared fused MLP body: bf16 MXU operands, f32 accumulation/bias/ReLU."""
    h1 = jnp.dot(x_bf16, w1, preferred_element_type=jnp.float32) + b1
    h1 = jnp.maximum(h1, 0.0).astype(jnp.bfloat16)           # relu(fc1) -> bf16
    h2 = jnp.dot(h1, w2, preferred_element_type=jnp.float32) + b2
    h2 = jnp.maximum(h2, 0.0).astype(jnp.bfloat16)           # relu(fc2) -> bf16
    q = jnp.dot(h2, w3, preferred_element_type=jnp.float32) + b3
    return q                                                  # (tb, num_actions) f32


def dqn_forward_kernel(x_ref, w1_ref, b1_ref, w2_ref, b2_ref, w3_ref, b3_ref, o_ref):
    q = _mlp(x_ref[...], w1_ref[...], b1_ref[...], w2_ref[...], b2_ref[...],
             w3_ref[...], b3_ref[...])
    o_ref[...] = q.astype(o_ref.dtype)                        # (tb, num_actions)


def dqn_argmax_kernel(x_ref, w1_ref, b1_ref, w2_ref, b2_ref, w3_ref, b3_ref, a_ref):
    # Forward pass fused with greedy-action selection: output is (tb, 1) int32.
    q = _mlp(x_ref[...], w1_ref[...], b1_ref[...], w2_ref[...], b2_ref[...],
             w3_ref[...], b3_ref[...])
    lane = jax.lax.broadcasted_iota(jnp.int32, q.shape, 1).astype(jnp.float32)
    q_max = jnp.max(q, axis=-1, keepdims=True)
    # First index attaining the max (float min-reduce over lanes; lanes < 128
    # are exactly representable in f32).
    idx = jnp.min(jnp.where(q >= q_max, lane, jnp.float32(q.shape[-1])),
                  axis=-1, keepdims=True)
    a_ref[...] = idx.astype(jnp.int32)


# ----------------------------- wrappers ------------------------------------ #

def _round_up(n, m):
    return ((n + m - 1) // m) * m


def _batch_tiling(B, tb_max):
    """Pick (tile, grid) so large batches split into an EVEN number of balanced
    steps (both v7x TensorCores busy) and tiny batches stay a single block."""
    if B <= 0:
        raise ValueError("batch size must be positive")
    if B < 2 * MIN_SPLIT:
        return B, 1                                   # single full-batch block
    grid_b = max(2, pl.cdiv(B, tb_max))
    if grid_b % 2:
        grid_b += 1                                   # even step count for 2 TCs
    tb = _round_up(pl.cdiv(B, grid_b), 8)             # sublane-aligned, balanced
    return tb, grid_b


def _dqn_call(kernel, x, params, out_feat, out_dtype, *, tb_max=DEFAULT_TB):
    w1, b1 = params["w1"], params["b1"]               # (S,128) bf16, (1,128) f32
    w2, b2 = params["w2"], params["b2"]               # (128,128) bf16, (1,128) f32
    w3, b3 = params["w3"], params["b3"]               # (128,A) bf16, (1,A) f32

    B, num_states = x.shape
    tb, grid_b = _batch_tiling(B, tb_max)
    b_pad = tb * grid_b

    xb = x.astype(jnp.bfloat16)                       # halves the streamed x DMA
    if b_pad != B:
        xb = jnp.pad(xb, ((0, b_pad - B), (0, 0)))

    flops = 2 * b_pad * (num_states * LANE + LANE * LANE + LANE * w3.shape[1])
    bytes_accessed = int(
        2 * (xb.size + w1.size + w2.size + w3.size)          # bf16 operands
        + 4 * (b1.size + b2.size + b3.size)                  # f32 biases
        + jnp.dtype(out_dtype).itemsize * b_pad * out_feat)  # output writeback

    out = pl.pallas_call(
        kernel,
        out_shape=jax.ShapeDtypeStruct((b_pad, out_feat), out_dtype),
        grid=(grid_b,),
        in_specs=[
            pl.BlockSpec((tb, num_states), lambda i: (i, 0)),   # streamed batch tile
            pl.BlockSpec(w1.shape, lambda i: (0, 0)),           # weights stay resident
            pl.BlockSpec(b1.shape, lambda i: (0, 0)),
            pl.BlockSpec(w2.shape, lambda i: (0, 0)),
            pl.BlockSpec(b2.shape, lambda i: (0, 0)),
            pl.BlockSpec(w3.shape, lambda i: (0, 0)),
            pl.BlockSpec(b3.shape, lambda i: (0, 0)),
        ],
        out_specs=pl.BlockSpec((tb, out_feat), lambda i: (i, 0)),
        compiler_params=pltpu.CompilerParams(
            dimension_semantics=("parallel",),        # shard batch steps across TCs (v7x)
        ),
        cost_estimate=pl.CostEstimate(
            flops=flops, transcendentals=0, bytes_accessed=bytes_accessed),
    )(xb, w1, b1, w2, b2, w3, b3)

    return out[:B]                                    # strip batch padding only


def dqn_forward(x, params, *, tb_max=DEFAULT_TB):
    """x: (B, num_states) f32 -> Q-values (B, num_actions) f32."""
    return _dqn_call(dqn_forward_kernel, x, params,
                     params["num_actions"], jnp.float32, tb_max=tb_max)


def dqn_greedy_action(x, params, *, tb_max=DEFAULT_TB):
    """x: (B, num_states) f32 -> greedy actions (B,) int32 (argmax fused in-kernel)."""
    out = _dqn_call(dqn_argmax_kernel, x, params, 1, jnp.int32, tb_max=tb_max)
    return out[:, 0]


def init_params(key, num_states, num_actions):
    """PyTorch-style Linear init, stored (in, out).  Hidden dims zero-padded to
    128 lanes once here; w3 keeps its true output width so the kernel writes a
    narrow (TB, num_actions) block.  Weights bf16 (MXU operands), biases f32."""
    assert NUM_HIDDEN <= LANE and num_actions <= LANE
    ks = jax.random.split(key, 6)

    def linear(kw, kb, fan_in, fan_out, pad_in, pad_out):
        bound = fan_in ** -0.5
        w = jax.random.uniform(kw, (fan_in, fan_out), jnp.float32, -bound, bound)
        b = jax.random.uniform(kb, (1, fan_out), jnp.float32, -bound, bound)
        w = jnp.pad(w, ((0, pad_in - fan_in), (0, pad_out - fan_out)))
        b = jnp.pad(b, ((0, 0), (0, pad_out - fan_out)))
        return w.astype(jnp.bfloat16), b              # bf16 weights, f32 bias

    w1, b1 = linear(ks[0], ks[1], num_states, NUM_HIDDEN, num_states, LANE)
    w2, b2 = linear(ks[2], ks[3], NUM_HIDDEN, NUM_HIDDEN, LANE, LANE)
    w3, b3 = linear(ks[4], ks[5], NUM_HIDDEN, num_actions, LANE, num_actions)
    return {"w1": w1, "b1": b1, "w2": w2, "b2": b2, "w3": w3, "b3": b3,
            "num_actions": num_actions}


def dqn_reference(x, p):
    """Pure-JAX reference using the same mixed precision as the kernel."""
    xb = x.astype(jnp.bfloat16)
    h1 = jnp.maximum(jnp.dot(xb, p["w1"], preferred_element_type=jnp.float32) + p["b1"], 0.0)
    h1 = h1.astype(jnp.bfloat16)
    h2 = jnp.maximum(jnp.dot(h1, p["w2"], preferred_element_type=jnp.float32) + p["b2"], 0.0)
    h2 = h2.astype(jnp.bfloat16)
    return jnp.dot(h2, p["w3"], preferred_element_type=jnp.float32) + p["b3"]


if __name__ == "__main__":
    num_states, num_actions = 4, 2

    key = jax.random.PRNGKey(0)
    k_p, k_x1, k_x2 = jax.random.split(key, 3)
    params = init_params(k_p, num_states, num_actions)

    # --- Small act-selection-sized batch: single full-batch grid step. ---
    x_small = jax.random.normal(k_x1, (8, num_states), jnp.float32)
    q_small = jax.block_until_ready(dqn_forward(x_small, params))
    q_small_ref = dqn_reference(x_small, params)
    assert q_small.shape == (8, num_actions)
    assert jnp.allclose(q_small, q_small_ref, atol=1e-3, rtol=1e-3)

    a_small = jax.block_until_ready(dqn_greedy_action(x_small, params))
    assert a_small.shape == (8,) and a_small.dtype == jnp.int32
    # Chosen action's Q must match the row max (tolerant to fp ties).
    assert jnp.all(q_small_ref[jnp.arange(8), a_small]
                   >= q_small_ref.max(axis=-1) - 1e-4)

    # --- Ragged replay-sized batch: even, balanced 2 x 520 grid split. ---
    x_big = jax.random.normal(k_x2, (1030, num_states), jnp.float32)
    q_big = jax.block_until_ready(dqn_forward(x_big, params))
    q_big_ref = dqn_reference(x_big, params)
    assert q_big.shape == (1030, num_actions)
    assert jnp.allclose(q_big, q_big_ref, atol=1e-3, rtol=1e-3)

    a_big = jax.block_until_ready(dqn_greedy_action(x_big, params))
    assert a_big.shape == (1030,) and a_big.dtype == jnp.int32
    assert jnp.all(q_big_ref[jnp.arange(1030), a_big]
                   >= q_big_ref.max(axis=-1) - 1e-4)

    print("KERNEL_OK")
</pallas_src>

<mosaic_0001>
module attributes {stable_mosaic.version = 11 : i64} {
  func.func @dqn_forward_kernel(%arg0: i32, %arg1: memref<8x4xbf16, #tpu.memory_space<vmem>>, %arg2: memref<4x128xbf16, #tpu.memory_space<vmem>>, %arg3: memref<1x128xf32, #tpu.memory_space<vmem>>, %arg4: memref<128x128xbf16, #tpu.memory_space<vmem>>, %arg5: memref<1x128xf32, #tpu.memory_space<vmem>>, %arg6: memref<128x2xbf16, #tpu.memory_space<vmem>>, %arg7: memref<1x2xf32, #tpu.memory_space<vmem>>, %arg8: memref<8x2xf32, #tpu.memory_space<vmem>>) attributes {dimension_semantics = [#tpu.dimension_semantics<parallel>], iteration_bounds = array<i64: 1>, scalar_prefetch = 0 : i64, scratch_operands = 0 : i64, tpu.core_type = #tpu.core_type<tc>, window_params = [{transform_indices = @transform_0, window_bounds = array<i64: 8, 4>}, {pipeline_mode = #tpu.pipeline_mode<synchronous>, transform_indices = @transform_1, window_bounds = array<i64: 4, 128>}, {pipeline_mode = #tpu.pipeline_mode<synchronous>, transform_indices = @transform_2, window_bounds = array<i64: 1, 128>}, {pipeline_mode = #tpu.pipeline_mode<synchronous>, transform_indices = @transform_3, window_bounds = array<i64: 128, 128>}, {pipeline_mode = #tpu.pipeline_mode<synchronous>, transform_indices = @transform_4, window_bounds = array<i64: 1, 128>}, {pipeline_mode = #tpu.pipeline_mode<synchronous>, transform_indices = @transform_5, window_bounds = array<i64: 128, 2>}, {pipeline_mode = #tpu.pipeline_mode<synchronous>, transform_indices = @transform_6, window_bounds = array<i64: 1, 2>}, {transform_indices = @transform_7, window_bounds = array<i64: 8, 2>}]} {
    %c0 = arith.constant 0 : index
    %c0_0 = arith.constant 0 : index
    %0 = vector.load %arg1[%c0, %c0_0] : memref<8x4xbf16, #tpu.memory_space<vmem>>, vector<8x4xbf16>
    %c0_1 = arith.constant 0 : index
    %c0_2 = arith.constant 0 : index
    %1 = vector.load %arg2[%c0_1, %c0_2] : memref<4x128xbf16, #tpu.memory_space<vmem>>, vector<4x128xbf16>
    %c0_3 = arith.constant 0 : index
    %c0_4 = arith.constant 0 : index
    %2 = vector.load %arg3[%c0_3, %c0_4] : memref<1x128xf32, #tpu.memory_space<vmem>>, vector<1x128xf32>
    %c0_5 = arith.constant 0 : index
    %c0_6 = arith.constant 0 : index
    %3 = vector.load %arg4[%c0_5, %c0_6] : memref<128x128xbf16, #tpu.memory_space<vmem>>, vector<128x128xbf16>
    %c0_7 = arith.constant 0 : index
    %c0_8 = arith.constant 0 : index
    %4 = vector.load %arg5[%c0_7, %c0_8] : memref<1x128xf32, #tpu.memory_space<vmem>>, vector<1x128xf32>
    %c0_9 = arith.constant 0 : index
    %c0_10 = arith.constant 0 : index
    %5 = vector.load %arg6[%c0_9, %c0_10] : memref<128x2xbf16, #tpu.memory_space<vmem>>, vector<128x2xbf16>
    %c0_11 = arith.constant 0 : index
    %c0_12 = arith.constant 0 : index
    %6 = vector.load %arg7[%c0_11, %c0_12] : memref<1x2xf32, #tpu.memory_space<vmem>>, vector<1x2xf32>
    %cst = arith.constant dense<0.000000e+00> : vector<8x128xf32>
    %7 = tpu.matmul %0, %1, %cst {dimension_numbers = #tpu.dot_dimension_numbers<[1], [0], [0], [1], [0, 0, 1, 1], [], []>} : vector<8x4xbf16>, vector<4x128xbf16>, vector<8x128xf32> -> vector<8x128xf32>
    %8 = vector.broadcast %2 : vector<1x128xf32> to vector<8x128xf32>
    %9 = arith.addf %7, %8 : vector<8x128xf32>
    %cst_13 = arith.constant 0.000000e+00 : f32
    %10 = vector.broadcast %cst_13 : f32 to vector<8x128xf32>
    %11 = arith.maximumf %9, %10 : vector<8x128xf32>
    %12 = arith.truncf %11 : vector<8x128xf32> to vector<8x128xbf16>
    %cst_14 = arith.constant dense<0.000000e+00> : vector<8x128xf32>
    %13 = tpu.matmul %12, %3, %cst_14 {dimension_numbers = #tpu.dot_dimension_numbers<[1], [0], [0], [1], [0, 0, 1, 1], [], []>} : vector<8x128xbf16>, vector<128x128xbf16>, vector<8x128xf32> -> vector<8x128xf32>
    %14 = vector.broadcast %4 : vector<1x128xf32> to vector<8x128xf32>
    %15 = arith.addf %13, %14 : vector<8x128xf32>
    %cst_15 = arith.constant 0.000000e+00 : f32
    %16 = vector.broadcast %cst_15 : f32 to vector<8x128xf32>
    %17 = arith.maximumf %15, %16 : vector<8x128xf32>
    %18 = arith.truncf %17 : vector<8x128xf32> to vector<8x128xbf16>
    %cst_16 = arith.constant dense<0.000000e+00> : vector<8x2xf32>
    %19 = tpu.matmul %18, %5, %cst_16 {dimension_numbers = #tpu.dot_dimension_numbers<[1], [0], [0], [1], [0, 0, 1, 1], [], []>} : vector<8x128xbf16>, vector<128x2xbf16>, vector<8x2xf32> -> vector<8x2xf32>
    %20 = vector.broadcast %6 : vector<1x2xf32> to vector<8x2xf32>
    %21 = arith.addf %19, %20 : vector<8x2xf32>
    %c0_17 = arith.constant 0 : index
    %c0_18 = arith.constant 0 : index
    %22 = vector.load %arg8[%c0_17, %c0_18] : memref<8x2xf32, #tpu.memory_space<vmem>>, vector<8x2xf32>
    tpu.vector_store %arg8[%c0_17, %c0_18], %21 {strides = array<i32>} : memref<8x2xf32, #tpu.memory_space<vmem>>, vector<8x2xf32>,
    return
  }
  func.func @transform_0(%arg0: i32) -> (i32, i32) {
    %c0_i32 = arith.constant 0 : i32
    %c0_i32_0 = arith.constant 0 : i32
    return %arg0, %c0_i32 : i32, i32
  }
  func.func @transform_1(%arg0: i32) -> (i32, i32) {
    %c0_i32 = arith.constant 0 : i32
    %c0_i32_0 = arith.constant 0 : i32
    %c0_i32_1 = arith.constant 0 : i32
    return %c0_i32, %c0_i32_0 : i32, i32
  }
  func.func @transform_2(%arg0: i32) -> (i32, i32) {
    %c0_i32 = arith.constant 0 : i32
    %c0_i32_0 = arith.constant 0 : i32
    %c0_i32_1 = arith.constant 0 : i32
    return %c0_i32, %c0_i32_0 : i32, i32
  }
  func.func @transform_3(%arg0: i32) -> (i32, i32) {
    %c0_i32 = arith.constant 0 : i32
    %c0_i32_0 = arith.constant 0 : i32
    %c0_i32_1 = arith.constant 0 : i32
    return %c0_i32, %c0_i32_0 : i32, i32
  }
  func.func @transform_4(%arg0: i32) -> (i32, i32) {
    %c0_i32 = arith.constant 0 : i32
    %c0_i32_0 = arith.constant 0 : i32
    %c0_i32_1 = arith.constant 0 : i32
    return %c0_i32, %c0_i32_0 : i32, i32
  }
  func.func @transform_5(%arg0: i32) -> (i32, i32) {
    %c0_i32 = arith.constant 0 : i32
    %c0_i32_0 = arith.constant 0 : i32
    %c0_i32_1 = arith.constant 0 : i32
    return %c0_i32, %c0_i32_0 : i32, i32
  }
  func.func @transform_6(%arg0: i32) -> (i32, i32) {
    %c0_i32 = arith.constant 0 : i32
    %c0_i32_0 = arith.constant 0 : i32
    %c0_i32_1 = arith.constant 0 : i32
    return %c0_i32, %c0_i32_0 : i32, i32
  }
  func.func @transform_7(%arg0: i32) -> (i32, i32) {
    %c0_i32 = arith.constant 0 : i32
    %c0_i32_0 = arith.constant 0 : i32
    return %arg0, %c0_i32 : i32, i32
  }
}

</mosaic_0001>

<bundles_post_ra>
// kernel: tpu_custom_call.1
= control target key start
LH: loop header
LB: loop body
LE: loop exit
PB: predicated region body
PF: predicated region fallthrough
CT: control target
= control target key end

     0   :  { %vm74_vm0 = vcmask 1041408   ;;  %v420_v0 = vmov 0.0   ;;  %vm421_vm1 = vmmov 0   ;;  %vm70_vm2 = vcmask 31744   ;;  %s548_s1 = inlined_call_operand.vmem [shape: bf16[4,128], index: 1, kind: input, shape index: {}]   ;;  %s549_s0 = inlined_call_operand.vmem [shape: bf16[8,4], index: 0, kind: input, shape index: {}]   ;;  %s550_s3 = inlined_call_operand.vmem [shape: bf16[128,128], index: 3, kind: input, shape index: {}]   ;;  %s551_s5 = inlined_call_operand.vmem [shape: bf16[128,2], index: 5, kind: input, shape index: {}]   ;;  %s552_s2 = inlined_call_operand.vmem [shape: f32[1,128], index: 2, kind: input, shape index: {}]   ;;  %s553_s4 = inlined_call_operand.vmem [shape: f32[1,128], index: 4, kind: input, shape index: {}]   ;;  %s554_s6 = inlined_call_operand.vmem [shape: f32[1,2], index: 6, kind: input, shape index: {}]   ;;  %s555_s7 = inlined_call_operand.vmem [shape: f32[8,2], index: 7, kind: output, shape index: {}]  }
   0x1   :  { %356 = vmatprep.subr.bf16.mxu0 %v420_v0  ;;  %v28_v1 = vld [vmem:[%s548_s1] sm:$0x3]  ;;  %358 = vmatprep.mubr.msk.bf16.mxu0 %vm421_vm1, %v420_v0  ;;  %v405_v5 = vld [vmem:[%s550_s3 + $0x8] sm:$0xff]   ;;  %v406_v6 = vld [vmem:[%s550_s3 + $0x10] sm:$0xff]   ;;  %vm310_vm3 = vcmask 15360  }
   0x2   :  { %v76_v2 = vsel %vm74_vm0, %v28_v1, 0  ;;  %362 = vmatprep.subr.bf16.mxu1 %v420_v0  ;;  %v404_v3 = vld [vmem:[%s550_s3] sm:$0xff]   ;;  %378 = vmatprep.mubr.msk.bf16.mxu1 %vm421_vm1, %v420_v0  ;;  %v407_v7 = vld [vmem:[%s550_s3 + $0x18] sm:$0xff]   ;;  %v409_v9 = vld [vmem:[%s550_s3 + $0x28] sm:$0xff]  }
   0x3   :  { %357 = vmatpush3.bf16.msra.mxu0 %v76_v2  ;;  %v27_v4 = vld [vmem:[%s549_s0] sm:$0xf]  ;;  %363 = vmatpush3.bf16.msra.mxu1 %v404_v3  ;;  %v410_v10 = vld [vmem:[%s550_s3 + $0x30] sm:$0xff]   ;;  %v411_v11 = vld [vmem:[%s550_s3 + $0x38] sm:$0xff]  }
   0x4   :  { %382 = vmatprep.subr.bf16.mxu0 %v420_v0  ;;  %364 = vmatprep.subr.bf16.mxu1 %v420_v0  ;;  %v408_v8 = vld [vmem:[%s550_s3 + $0x20] sm:$0xff]   ;;  %v413_v13 = vld [vmem:[%s551_s5 + $0x8] sm:$0xff]   ;;  %v414_v14 = vld [vmem:[%s551_s5 + $0x10] sm:$0xff]  }
   0x5   :  { %v412_v12 = vld [vmem:[%s551_s5] sm:$0xff]   ;;  %v415_v15 = vld [vmem:[%s551_s5 + $0x18] sm:$0xff]   ;;  %v417_v17 = vld [vmem:[%s551_s5 + $0x28] sm:$0xff]  }
   0x6   :  { %359 = vmatmul.mubr.msk.bf16.vlgmr.msra.gmra.mrb[0].mxu0 %vm70_vm2, %v27_v4  ;;  %v416_v16 = vld [vmem:[%s551_s5 + $0x20] sm:$0xff]   ;;  %v418_v26 = vld [vmem:[%s551_s5 + $0x30] sm:$0xff]   ;;  %v419_v27 = vld [vmem:[%s551_s5 + $0x38] sm:$0xff]  }
   0x7   :  { %398 = vmatprep.mubr.msk.bf16.mxu0 %vm421_vm1, %v420_v0  ;;  %365 = vmatpush3.bf16.msra.mxu1 %v405_v5  ;;  %v316_v18 = vld [vmem:[%s552_s2] ss:$0 sm:$0xff] }
   0x8   :  { %366 = vmatprep.subr.bf16.mxu1 %v420_v0  ;;  %383 = vmatpush3.bf16.msra.mxu0 %v412_v12  ;;  %v318_v28 = vld [vmem:[%s553_s4] ss:$0 sm:$0xff] }
   0x9   :  { %384 = vmatprep.subr.bf16.mxu0 %v420_v0  ;;  %v327_v36 = vld [vmem:[%s554_s6] ss:$0 sm:$0xff] }
   0xb   :  { %367 = vmatpush3.bf16.msra.mxu1 %v406_v6 }
   0xc   :  { %368 = vmatprep.subr.bf16.mxu1 %v420_v0  ;;  %385 = vmatpush3.bf16.msra.mxu0 %v413_v13 }
   0xd   :  { %386 = vmatprep.subr.bf16.mxu0 %v420_v0 }
   0xf   :  { %369 = vmatpush3.bf16.msra.mxu1 %v407_v7 }
  0x10   :  { %370 = vmatprep.subr.bf16.mxu1 %v420_v0  ;;  %387 = vmatpush3.bf16.msra.mxu0 %v414_v14 }
  0x11   :  { %388 = vmatprep.subr.bf16.mxu0 %v420_v0 }
  0x13   :  { %371 = vmatpush3.bf16.msra.mxu1 %v408_v8 }
  0x14   :  { %372 = vmatprep.subr.bf16.mxu1 %v420_v0  ;;  %389 = vmatpush3.bf16.msra.mxu0 %v415_v15 }
  0x15   :  { %390 = vmatprep.subr.bf16.mxu0 %v420_v0 }
  0x17   :  { %373 = vmatpush3.bf16.msra.mxu1 %v409_v9 }
  0x18   :  { %374 = vmatprep.subr.bf16.mxu1 %v420_v0  ;;  %391 = vmatpush3.bf16.msra.mxu0 %v416_v16 }
  0x19   :  { %392 = vmatprep.subr.bf16.mxu0 %v420_v0 }
  0x1b   :  { %375 = vmatpush3.bf16.msra.mxu1 %v410_v10 }
  0x1c   :  { %376 = vmatprep.subr.bf16.mxu1 %v420_v0  ;;  %393 = vmatpush3.bf16.msra.mxu0 %v417_v17 }
  0x1d   :  { %394 = vmatprep.subr.bf16.mxu0 %v420_v0 }
  0x1f   :  { %377 = vmatpush3.bf16.msra.mxu1 %v411_v11 }
  0x20   :  { %395 = vmatpush3.bf16.msra.mxu0 %v418_v26 }
  0x21   :  { %396 = vmatprep.subr.bf16.mxu0 %v420_v0 }
  0x24   :  { %397 = vmatpush3.bf16.msra.mxu0 %v419_v27 }
  0xd9   :  { %v112_v19 = vpop.f32.mrb[0].mxu0 }
  0xda   :  { %v113_v20 = vadd.f32 %v316_v18, %v112_v19  ;;  %v360_v21 = vpop.f32.mrb[1].mxu0 }
  0xdb   :  { %v115_v22 = vpop.f32.mrb[2].mxu0 }
  0xdc   :  { %v118_v23 = vmax.f32 %v113_v20, 0.0  ;;  %v361_v24 = vpop.f32.mrb[3].mxu0 }
  0xde   :  { %v119_v25 = vpack.c.bf16 %v118_v23, %v118_v23 }
  0xe0   :  { %379 = vmatmul.mubr.bf16.vlgmr.msra.gmra.mrb[0].mxu1 %v119_v25 }
 0x1b3   :  { %v208_v29 = vpop.f32.mrb[0].mxu1 }
 0x1b4   :  { %v209_v30 = vadd.f32 %v318_v28, %v208_v29  ;;  %v380_v31 = vpop.f32.mrb[1].mxu1 }
 0x1b5   :  { %v211_v32 = vpop.f32.mrb[2].mxu1 }
 0x1b6   :  { %v214_v33 = vmax.f32 %v209_v30, 0.0  ;;  %v381_v34 = vpop.f32.mrb[3].mxu1 }
 0x1b8   :  { %v215_v35 = vpack.c.bf16 %v214_v33, %v214_v33 }
 0x1ba   :  { %399 = vmatmul.mubr.bf16.vlgmr.msra.gmra.mrb[4].mxu0 %v215_v35 }
 0x28d   :  { %v304_v37 = vpop.f32.mrb[4].mxu0 }
 0x28e   :  { %v305_v38 = vadd.f32 %v327_v36, %v304_v37  ;;  %v400_v39 = vpop.f32.mrb[5].mxu0 }
 0x28f   :  { %v307_v40 = vpop.f32.mrb[6].mxu0 }
 0x290   :  { %311 = vst.msk [vmem:[%s555_s7] sm:$0xff] %vm310_vm3, %v305_v38  ;;  %v401_v41 = vpop.f32.mrb[7].mxu0 }

</bundles_post_ra>
